<compile_context>
chip_gen: v7x
topology: tpu7x:2x2x1
jax: 0.10.0
libtpu: 0.0.40
codegen_flags: <defaults>
</compile_context>

<pallas_src>
import functools

import jax
import jax.numpy as jnp
from jax.experimental import pallas as pl
from jax.experimental.pallas import tpu as pltpu

H1 = 64   # fc1 output width
H2 = 8    # fc2 output width


def _round_up(n, m):
    return ((n + m - 1) // m) * m


def _leaky_relu(x, negative_slope=0.01):
    # matches torch.nn.functional.leaky_relu default slope
    return jnp.where(x >= 0, x, negative_slope * x)


def _softplus(x):
    # numerically stable softplus (beta=1), matches F.softplus
    return jnp.maximum(x, 0.0) + jnp.log1p(jnp.exp(-jnp.abs(x)))


def _actor_kernel(x_ref, w1t_ref, w2t_ref, wht_ref, b_ref, out_ref, *, action_dim):
    """One batch tile, transposed math.

    x_ref   : (TB, S)        batch-major input tile (as supplied by the caller)
    w1t_ref : (64, S)        W1ᵀ   (resident)
    w2t_ref : (8, 64)        W2ᵀ   (resident)
    wht_ref : (2A, 8)        [Wmu|Wsig]ᵀ (resident)
    b_ref   : (max(64,2A),3) packed bias columns: [:64,0]=b1, [:8,1]=b2, [:2A,2]=bhead
    out_ref : (2A, TB)       rows 0..A-1 = mu, rows A..2A-1 = sigma (batch on lanes)
    """
    x = x_ref[...]                                                # (TB, S)

    # fc1: h1ᵀ = W1ᵀ @ xᵀ as an NT matmul (contraction on both minor dims);
    # MXU accumulates in f32 even if x / W1ᵀ are bf16.
    h1t = jax.lax.dot_general(
        w1t_ref[...], x, (((1,), (1,)), ((), ())),
        preferred_element_type=jnp.float32)                       # (64, TB)
    h1t = _leaky_relu(h1t + b_ref[0:H1, 0:1])                     # lane-broadcast bias

    # fc2
    h2t = jnp.dot(w2t_ref[...], h1t,
                  preferred_element_type=jnp.float32)             # (8, TB)
    h2t = _leaky_relu(h2t + b_ref[0:H2, 1:2])

    # fused heads: rows 0..A-1 = mu, rows A..2A-1 = sigma_pre
    headt = jnp.dot(wht_ref[...], h2t,
                    preferred_element_type=jnp.float32)           # (2A, TB)
    headt = headt + b_ref[0:2 * action_dim, 2:3]

    # softplus(+1e-5) only on the sigma rows.  The mask lives on the (tiny)
    # 8-row sublane axis, so this costs only TB/128 vregs per tile.
    row = jax.lax.broadcasted_iota(jnp.int32, headt.shape, 0)
    out = jnp.where(row >= action_dim, _softplus(headt) + 1e-5, headt)
    out_ref[...] = out.astype(out_ref.dtype)                      # dense (8, TB) store


def _plan_tiles(batch, block_batch):
    """Pick (tile_rows, padded_rows, grid) so that, whenever possible, no pad
    copy of x is needed and the grid has >= 2 steps (v7x megacore)."""
    if batch % 128 == 0:
        # Tile with a divisor of B that is a multiple of 128 -> no pad copy.
        m = batch // 128
        target = max(2, pl.cdiv(batch, block_batch))
        g = next((c for c in range(target, m + 1) if m % c == 0), m if m else 1)
        return batch // g, batch, g
    if batch <= 4096:
        # Small / unaligned batch: one full-extent block (full-dim block shapes
        # need no (8,128) divisibility), zero pad, zero copies.
        return batch, batch, 1
    # Large batch not a multiple of 128: pad up to the next 128 multiple.
    # This is the only remaining case that costs an extra HBM pass over x.
    padded = _round_up(batch, 128)
    m = padded // 128
    target = max(2, pl.cdiv(padded, block_batch))
    g = next(c for c in range(target, m + 1) if m % c == 0)
    return padded // g, padded, g


def actor_forward(x, params, *, block_batch=4096, first_layer_dtype="auto",
                  out_dtype=jnp.float32, return_packed=False):
    """x: [B, state_dim].

    Returns (mu, sigma), each [B, action_dim] in `out_dtype`, or — with
    return_packed=True — the raw (2*action_dim, B) kernel output (rows 0..A-1
    = mu, rows A..2A-1 = sigma) so the consumer can fuse the split.

    first_layer_dtype: "auto" (bf16 for B >= 16384), None (keep x dtype), or a
    dtype.  MXU accumulation is always f32.
    """
    w1t = params["w1t"]            # (64, S)
    w2t = params["w2t"]            # (8, 64)
    wht = params["w_head_t"]       # (2A, 8)
    b_packed = params["b_packed"]  # (max(64, 2A), 3)

    state_dim = w1t.shape[1]
    action_dim = wht.shape[0] // 2
    batch = x.shape[0]

    tb, padded_b, grid = _plan_tiles(batch, block_batch)
    if padded_b != batch:
        # Only for large batches that are not a multiple of 128.
        x = jnp.pad(x, ((0, padded_b - batch), (0, 0)))

    if first_layer_dtype == "auto":
        first_layer_dtype = jnp.bfloat16 if batch >= 16384 else None
    if first_layer_dtype is not None:
        x = x.astype(first_layer_dtype)
        w1t = w1t.astype(first_layer_dtype)

    kernel = functools.partial(_actor_kernel, action_dim=action_dim)

    out = pl.pallas_call(
        kernel,
        out_shape=jax.ShapeDtypeStruct((2 * action_dim, padded_b), out_dtype),
        grid=(grid,),
        in_specs=[
            pl.BlockSpec((tb, state_dim), lambda i: (i, 0)),            # x tile
            pl.BlockSpec((H1, state_dim), lambda i: (0, 0)),            # W1ᵀ (resident)
            pl.BlockSpec((H2, H1), lambda i: (0, 0)),                   # W2ᵀ (resident)
            pl.BlockSpec((2 * action_dim, H2), lambda i: (0, 0)),       # [Wmu|Wsig]ᵀ
            pl.BlockSpec(b_packed.shape, lambda i: (0, 0)),             # packed biases
        ],
        out_specs=pl.BlockSpec((2 * action_dim, tb), lambda i: (0, i)),
        compiler_params=pltpu.CompilerParams(
            dimension_semantics=("parallel",)),   # batch grid split over TCs on v7x
    )(x, w1t, w2t, wht, b_packed)

    if return_packed:
        return out if padded_b == batch else out[:, :batch]

    mu = out[:action_dim, :batch].T
    sigma = out[action_dim:, :batch].T
    return mu, sigma


def init_actor_params(key, state_dim, action_dim):
    """Mimics nn.Linear's U(-1/sqrt(fan_in), 1/sqrt(fan_in)).  Kernel operands
    are stored pre-transposed (features-major) with the two heads fused and the
    biases packed into one small resident slab."""
    def linear(key, fan_in, fan_out):
        kw, kb = jax.random.split(key)
        bound = 1.0 / jnp.sqrt(fan_in)
        w = jax.random.uniform(kw, (fan_in, fan_out), jnp.float32, -bound, bound)
        b = jax.random.uniform(kb, (fan_out,), jnp.float32, -bound, bound)
        return w, b

    k1, k2, k3, k4 = jax.random.split(key, 4)
    w1, b1 = linear(k1, state_dim, H1)
    w2, b2 = linear(k2, H1, H2)
    wmu, bmu = linear(k3, H2, action_dim)
    wsig, bsig = linear(k4, H2, action_dim)

    w_head = jnp.concatenate([wmu, wsig], axis=1)                  # (8, 2A)
    b_head = jnp.concatenate([bmu, bsig], axis=0)                  # (2A,)

    rows = max(H1, 2 * action_dim)
    b_packed = jnp.zeros((rows, 3), jnp.float32)
    b_packed = b_packed.at[:H1, 0].set(b1)
    b_packed = b_packed.at[:H2, 1].set(b2)
    b_packed = b_packed.at[:2 * action_dim, 2].set(b_head)

    return {
        # kernel operands (transposed / fused / packed)
        "w1t": w1.T, "w2t": w2.T, "w_head_t": w_head.T, "b_packed": b_packed,
        # original-orientation copies kept only for the pure-JAX reference
        "w1": w1, "b1": b1, "w2": w2, "b2": b2,
        "wmu": wmu, "bmu": bmu, "wsig": wsig, "bsig": bsig,
    }


def actor_reference(x, params):
    """Pure-JAX reference matching the PyTorch module."""
    hp = jax.lax.Precision.HIGHEST
    h1 = _leaky_relu(jnp.dot(x, params["w1"], precision=hp) + params["b1"])
    h2 = _leaky_relu(jnp.dot(h1, params["w2"], precision=hp) + params["b2"])
    mu = jnp.dot(h2, params["wmu"], precision=hp) + params["bmu"]
    sigma = _softplus(jnp.dot(h2, params["wsig"], precision=hp) + params["bsig"]) + 1e-5
    return mu, sigma


if __name__ == "__main__":
    key = jax.random.PRNGKey(0)
    k_param, k_x1, k_x2, k_x3 = jax.random.split(key, 4)

    state_dim, action_dim = 16, 4
    params = init_actor_params(k_param, state_dim, action_dim)

    # --- tiny batch: single full-extent block ---
    x_small = jax.random.normal(k_x1, (8, state_dim), jnp.float32)
    mu_s, sig_s = actor_forward(x_small, params)
    jax.block_until_ready((mu_s, sig_s))
    mu_ref, sig_ref = actor_reference(x_small, params)
    assert mu_s.shape == (8, action_dim) and sig_s.shape == (8, action_dim)
    assert bool(jnp.all(sig_s > 0))
    assert bool(jnp.allclose(mu_s, mu_ref, rtol=1e-5, atol=1e-4))
    assert bool(jnp.allclose(sig_s, sig_ref, rtol=1e-5, atol=1e-4))

    # --- non-128-aligned batch: single full-extent block, no pad copy ---
    x_mid = jax.random.normal(k_x2, (200, state_dim), jnp.float32)
    mu_m, sig_m = actor_forward(x_mid, params)
    jax.block_until_ready((mu_m, sig_m))
    mu_mref, sig_mref = actor_reference(x_mid, params)
    assert mu_m.shape == (200, action_dim) and sig_m.shape == (200, action_dim)
    assert bool(jnp.all(sig_m > 0))
    assert bool(jnp.allclose(mu_m, mu_mref, rtol=1e-5, atol=1e-4))
    assert bool(jnp.allclose(sig_m, sig_mref, rtol=1e-5, atol=1e-4))

    # --- 128-aligned batch: 2-step batch grid, no pad, dense lane stores ---
    x_big = jax.random.normal(k_x3, (512, state_dim), jnp.float32)
    mu_b, sig_b = actor_forward(x_big, params)
    jax.block_until_ready((mu_b, sig_b))
    mu_bref, sig_bref = actor_reference(x_big, params)
    assert mu_b.shape == (512, action_dim) and sig_b.shape == (512, action_dim)
    assert bool(jnp.all(sig_b > 0))
    assert bool(jnp.allclose(mu_b, mu_bref, rtol=1e-5, atol=1e-4))
    assert bool(jnp.allclose(sig_b, sig_bref, rtol=1e-5, atol=1e-4))

    # --- bf16 first-layer path (halves dominant HBM read at large batch) ---
    mu_h, sig_h = actor_forward(x_big, params, first_layer_dtype=jnp.bfloat16)
    jax.block_until_ready((mu_h, sig_h))
    assert bool(jnp.all(sig_h > 0))
    assert bool(jnp.allclose(mu_h, mu_bref, rtol=5e-2, atol=5e-2))
    assert bool(jnp.allclose(sig_h, sig_bref, rtol=5e-2, atol=5e-2))

    # --- packed output path (no wrapper-side split copies) ---
    packed = actor_forward(x_big, params, return_packed=True)
    jax.block_until_ready(packed)
    assert packed.shape == (2 * action_dim, 512)
    assert bool(jnp.allclose(packed[:action_dim].T, mu_bref, rtol=1e-5, atol=1e-4))

    print("KERNEL_OK")
</pallas_src>

<mosaic_0001>
module attributes {stable_mosaic.version = 11 : i64} {
  func.func @_actor_kernel(%arg0: i32, %arg1: memref<8x16xf32, #tpu.memory_space<vmem>>, %arg2: memref<64x16xf32, #tpu.memory_space<vmem>>, %arg3: memref<8x64xf32, #tpu.memory_space<vmem>>, %arg4: memref<8x8xf32, #tpu.memory_space<vmem>>, %arg5: memref<64x3xf32, #tpu.memory_space<vmem>>, %arg6: memref<8x8xf32, #tpu.memory_space<vmem>>) attributes {dimension_semantics = [#tpu.dimension_semantics<parallel>], iteration_bounds = array<i64: 1>, scalar_prefetch = 0 : i64, scratch_operands = 0 : i64, tpu.core_type = #tpu.core_type<tc>, window_params = [{transform_indices = @transform_0, window_bounds = array<i64: 8, 16>}, {pipeline_mode = #tpu.pipeline_mode<synchronous>, transform_indices = @transform_1, window_bounds = array<i64: 64, 16>}, {pipeline_mode = #tpu.pipeline_mode<synchronous>, transform_indices = @transform_2, window_bounds = array<i64: 8, 64>}, {pipeline_mode = #tpu.pipeline_mode<synchronous>, transform_indices = @transform_3, window_bounds = array<i64: 8, 8>}, {pipeline_mode = #tpu.pipeline_mode<synchronous>, transform_indices = @transform_4, window_bounds = array<i64: 64, 3>}, {transform_indices = @transform_5, window_bounds = array<i64: 8, 8>}]} {
    %c0 = arith.constant 0 : index
    %c0_0 = arith.constant 0 : index
    %0 = vector.load %arg1[%c0, %c0_0] : memref<8x16xf32, #tpu.memory_space<vmem>>, vector<8x16xf32>
    %c0_1 = arith.constant 0 : index
    %c0_2 = arith.constant 0 : index
    %1 = vector.load %arg2[%c0_1, %c0_2] : memref<64x16xf32, #tpu.memory_space<vmem>>, vector<64x16xf32>
    %cst = arith.constant dense<0.000000e+00> : vector<64x8xf32>
    %2 = tpu.matmul %1, %0, %cst {dimension_numbers = #tpu.dot_dimension_numbers<[1], [1], [0], [0], [0, 0, 1, 0], [], []>} : vector<64x16xf32>, vector<8x16xf32>, vector<64x8xf32> -> vector<64x8xf32>
    %c0_3 = arith.constant 0 : index
    %c0_4 = arith.constant 0 : index
    %3 = vector.load %arg5[%c0_3, %c0_4] : memref<64x3xf32, #tpu.memory_space<vmem>>, vector<64x1xf32>
    %4 = vector.broadcast %3 : vector<64x1xf32> to vector<64x8xf32>
    %5 = arith.addf %2, %4 : vector<64x8xf32>
    %cst_5 = arith.constant 0.000000e+00 : f32
    %6 = vector.broadcast %cst_5 : f32 to vector<64x8xf32>
    %7 = arith.cmpf oge, %5, %6 : vector<64x8xf32>
    %cst_6 = arith.constant 0.00999999977 : f32
    %8 = vector.broadcast %cst_6 : f32 to vector<64x8xf32>
    %9 = arith.mulf %8, %5 : vector<64x8xf32>
    %10 = arith.select %7, %5, %9 : vector<64x8xi1>, vector<64x8xf32>
    %c0_7 = arith.constant 0 : index
    %c0_8 = arith.constant 0 : index
    %11 = vector.load %arg3[%c0_7, %c0_8] : memref<8x64xf32, #tpu.memory_space<vmem>>, vector<8x64xf32>
    %cst_9 = arith.constant dense<0.000000e+00> : vector<8x8xf32>
    %12 = tpu.matmul %11, %10, %cst_9 {dimension_numbers = #tpu.dot_dimension_numbers<[1], [0], [0], [1], [0, 0, 1, 1], [], []>} : vector<8x64xf32>, vector<64x8xf32>, vector<8x8xf32> -> vector<8x8xf32>
    %c0_10 = arith.constant 0 : index
    %c1 = arith.constant 1 : index
    %13 = vector.load %arg5[%c0_10, %c1] : memref<64x3xf32, #tpu.memory_space<vmem>>, vector<8x1xf32>
    %14 = vector.broadcast %13 : vector<8x1xf32> to vector<8x8xf32>
    %15 = arith.addf %12, %14 : vector<8x8xf32>
    %cst_11 = arith.constant 0.000000e+00 : f32
    %16 = vector.broadcast %cst_11 : f32 to vector<8x8xf32>
    %17 = arith.cmpf oge, %15, %16 : vector<8x8xf32>
    %cst_12 = arith.constant 0.00999999977 : f32
    %18 = vector.broadcast %cst_12 : f32 to vector<8x8xf32>
    %19 = arith.mulf %18, %15 : vector<8x8xf32>
    %20 = arith.select %17, %15, %19 : vector<8x8xi1>, vector<8x8xf32>
    %c0_13 = arith.constant 0 : index
    %c0_14 = arith.constant 0 : index
    %21 = vector.load %arg4[%c0_13, %c0_14] : memref<8x8xf32, #tpu.memory_space<vmem>>, vector<8x8xf32>
    %cst_15 = arith.constant dense<0.000000e+00> : vector<8x8xf32>
    %22 = tpu.matmul %21, %20, %cst_15 {dimension_numbers = #tpu.dot_dimension_numbers<[1], [0], [0], [1], [0, 0, 1, 1], [], []>} : vector<8x8xf32>, vector<8x8xf32>, vector<8x8xf32> -> vector<8x8xf32>
    %c0_16 = arith.constant 0 : index
    %c2 = arith.constant 2 : index
    %23 = vector.load %arg5[%c0_16, %c2] : memref<64x3xf32, #tpu.memory_space<vmem>>, vector<8x1xf32>
    %24 = vector.broadcast %23 : vector<8x1xf32> to vector<8x8xf32>
    %25 = arith.addf %22, %24 : vector<8x8xf32>
    %26 = tpu.iota {dimensions = array<i32: 0>} : vector<8x8xi32>
    %c4_i32 = arith.constant 4 : i32
    %27 = vector.broadcast %c4_i32 : i32 to vector<8x8xi32>
    %28 = arith.cmpi sge, %26, %27 : vector<8x8xi32>
    %cst_17 = arith.constant 0.000000e+00 : f32
    %29 = vector.broadcast %cst_17 : f32 to vector<8x8xf32>
    %30 = arith.maximumf %25, %29 : vector<8x8xf32>
    %31 = math.absf %25 : vector<8x8xf32>
    %cst_18 = arith.constant 0.000000e+00 : f32
    %32 = vector.broadcast %cst_18 : f32 to vector<8x8xf32>
    %33 = arith.subf %32, %31 : vector<8x8xf32>
    %34 = math.exp %33 : vector<8x8xf32>
    %35 = math.log1p %34 : vector<8x8xf32>
    %36 = arith.addf %30, %35 : vector<8x8xf32>
    %cst_19 = arith.constant 9.99999974E-6 : f32
    %37 = vector.broadcast %cst_19 : f32 to vector<8x8xf32>
    %38 = arith.addf %36, %37 : vector<8x8xf32>
    %39 = arith.select %28, %38, %25 : vector<8x8xi1>, vector<8x8xf32>
    %c0_20 = arith.constant 0 : index
    %c0_21 = arith.constant 0 : index
    %40 = vector.load %arg6[%c0_20, %c0_21] : memref<8x8xf32, #tpu.memory_space<vmem>>, vector<8x8xf32>
    tpu.vector_store %arg6[%c0_20, %c0_21], %39 {strides = array<i32>} : memref<8x8xf32, #tpu.memory_space<vmem>>, vector<8x8xf32>,
    return
  }
  func.func @transform_0(%arg0: i32) -> (i32, i32) {
    %c0_i32 = arith.constant 0 : i32
    %c0_i32_0 = arith.constant 0 : i32
    return %arg0, %c0_i32 : i32, i32
  }
  func.func @transform_1(%arg0: i32) -> (i32, i32) {
    %c0_i32 = arith.constant 0 : i32
    %c0_i32_0 = arith.constant 0 : i32
    %c0_i32_1 = arith.constant 0 : i32
    return %c0_i32, %c0_i32_0 : i32, i32
  }
  func.func @transform_2(%arg0: i32) -> (i32, i32) {
    %c0_i32 = arith.constant 0 : i32
    %c0_i32_0 = arith.constant 0 : i32
    %c0_i32_1 = arith.constant 0 : i32
    return %c0_i32, %c0_i32_0 : i32, i32
  }
  func.func @transform_3(%arg0: i32) -> (i32, i32) {
    %c0_i32 = arith.constant 0 : i32
    %c0_i32_0 = arith.constant 0 : i32
    %c0_i32_1 = arith.constant 0 : i32
    return %c0_i32, %c0_i32_0 : i32, i32
  }
  func.func @transform_4(%arg0: i32) -> (i32, i32) {
    %c0_i32 = arith.constant 0 : i32
    %c0_i32_0 = arith.constant 0 : i32
    %c0_i32_1 = arith.constant 0 : i32
    return %c0_i32, %c0_i32_0 : i32, i32
  }
  func.func @transform_5(%arg0: i32) -> (i32, i32) {
    %c0_i32 = arith.constant 0 : i32
    %c0_i32_0 = arith.constant 0 : i32
    return %c0_i32, %arg0 : i32, i32
  }
}

</mosaic_0001>

<bundles_post_ra>
// kernel: tpu_custom_call.1
= control target key start
LH: loop header
LB: loop body
LE: loop exit
PB: predicated region body
PF: predicated region fallthrough
CT: control target
= control target key end

     0   :  { %vm78_vm0 = vcmask 130048   ;;  %v554_v3 = vmov 0   ;;  %s681_s0 = inlined_call_operand.vmem [shape: f32[8,16], index: 0, kind: input, shape index: {}]   ;;  %s682_s1 = inlined_call_operand.vmem [shape: f32[64,16], index: 1, kind: input, shape index: {}]   ;;  %s683_s2 = inlined_call_operand.vmem [shape: f32[8,64], index: 2, kind: input, shape index: {}]   ;;  %s684_s3 = inlined_call_operand.vmem [shape: f32[8,8], index: 3, kind: input, shape index: {}]   ;;  %s685_s4 = inlined_call_operand.vmem [shape: f32[64,3], index: 4, kind: input, shape index: {}]   ;;  %s686_s5 = inlined_call_operand.hbm [shape: f32[8,8], index: 5, kind: output, shape index: {}]  }
   0x1   :  { %v21_v0 = vld [vmem:[%s681_s0] sm:$0xff]  ;;  %v23_v2 = vld [vmem:[%s682_s1 + $0x8] sm:$0xff]  ;;  %521 = vset.pattern.permute.xlu0 %v554_v3  ;;  %v24_v4 = vld [vmem:[%s682_s1 + $0x10] sm:$0xff]  ;;  %522 = vset.pattern.permute.xlu1 %v554_v3 }
   0x2   :  { %v22_v1 = vld [vmem:[%s682_s1] sm:$0xff]  ;;  %464 = vmatprep.subr.msk.mxu0 %vm78_vm0, %v21_v0  ;;  %v32_v6 = vld [vmem:[%s685_s4 + $0x10] sm:$0xff]  ;;  %v31_v7 = vld [vmem:[%s685_s4 + $0x8] sm:$0xff] }
   0x3   :  { %466 = vmatprep.mubr.msk.f32.mxu0 %vm78_vm0, %v22_v1  ;;  %465 = vmatpush3.xpose.msk.msra.mxu0 %vm78_vm0, %v21_v0  ;;  %v609_v5 = vld [vmem:[%s685_s4] sm:$0xff]  ;;  %v33_v8 = vld [vmem:[%s685_s4 + $0x18] sm:$0xff] }
   0x4   :  { %40 = vperm.xlu0 %521, %v609_v5   ;;  %50 = vperm.xlu1 %522, %v32_v6  }
   0x6   :  { %467 = vmatmul.mubr.msk.f32.vlgmr.msra.gmra.mrb[0].mxu0 %vm78_vm0, %v23_v2 }
   0x7   :  { %10 = vsyncpa [#allocation3], 0  ;;  %469 = vmatprep.mubr.msk.f32.mxu0 %vm78_vm0, %v24_v4  ;;  %v25_v9 = vld [vmem:[%s682_s1 + $0x18] sm:$0xff]  ;;  %v26_v10 = vld [vmem:[%s682_s1 + $0x20] sm:$0xff]  ;;  %v555_v18 = vmov 0.0|0.0   ;;  %vm556_vm1 = vmmov 0  }
   0x8   :  { %45 = vperm.xlu0 %521, %v31_v7   ;;  %55 = vperm.xlu1 %522, %v33_v8   ;;  %v34_v11 = vld [vmem:[%s685_s4 + $0x20] sm:$0xff]  ;;  %v35_v12 = vld [vmem:[%s685_s4 + $0x28] sm:$0xff]  ;;  %v28_v14 = vld [vmem:[%s682_s1 + $0x30] sm:$0xff]  ;;  %v557_v19 = vmov 0.0   ;;  %v558_v20 = vmov 1   ;;  %vm242_vm10 = vcmask 523264  }
   0x9   :  { %v27_v13 = vld [vmem:[%s682_s1 + $0x28] sm:$0xff]  ;;  %v36_v15 = vld [vmem:[%s685_s4 + $0x30] sm:$0xff]  ;;  %v37_v16 = vld [vmem:[%s685_s4 + $0x38] sm:$0xff]  ;;  %502 = vmatprep.subr.bf16.mxu1 %v555_v18  ;;  %494 = vmatprep.mubr.msk.f32.mxu1 %vm556_vm1, %v557_v19  ;;  %v559_v2 = vmov 2   ;;  %vm324_vm12 = vcmask 64512  }
   0xa   :  { %470 = vmatmul.mubr.msk.f32.gmra.mrb[2].mxu0 %vm78_vm0, %v25_v9  ;;  %v29_v17 = vld [vmem:[%s682_s1 + $0x38] sm:$0xff]  ;;  %497 = vmatprep.subr.mxu0 %v557_v19  ;;  %v235_v1 = vld [vmem:[%s683_s2] sm:$0xff]  ;;  %s560_s2 = smov [#allocation2]  }
   0xb   :  { %472 = vmatprep.mubr.msk.f32.mxu0 %vm78_vm0, %v26_v10  ;;  %v319_v9 = vld [vmem:[%s684_s3] sm:$0xff]  ;;  %s425_s3 = sshll.u32 %s560_s2, 4  ;;  %s426_s3 = int_to_ptr.vmem [resolvable:$true] %s425_s3 }
   0xc   :  { %60 = vperm.xlu0 %521, %v34_v11   ;;  %65 = vperm.xlu1 %522, %v35_v12   ;;  %s530_s27 = scalar_lea.vmem %s426_s3, 128  ;;  %p535_p1 = scmp.lt.s32.totalorder %s426_s3, %s426_s3 }
   0xd   :  { %p531_p0 = scmp.ne.s32.totalorder %s426_s3, %s530_s27  ;;  %p536_p2 = scmp.lt.s32.totalorder %s530_s27, %s530_s27 }
   0xe   :  { %473 = vmatmul.mubr.msk.f32.gmra.mrb[4].mxu0 %vm78_vm0, %v27_v13 }
   0xf   :  { %475 = vmatprep.mubr.msk.f32.mxu0 %vm78_vm0, %v28_v14  ;;  %p537_p3 = por %p536_p2, %p535_p1 }
  0x10   :  { %70 = vperm.xlu0 %521, %v36_v15   ;;  %75 = vperm.xlu1 %522, %v37_v16  }
  0x11   :  { %p538_p4 = pnand %p537_p3, %p531_p0 }
  0x12   :  { %476 = vmatmul.mubr.msk.f32.gmra.mrb[6].mxu0 %vm78_vm0, %v29_v17 }
  0x13   :  { %499 = vmatprep.mubr.msk.f32.mxu0 %vm556_vm1, %v557_v19 }
  0x14   :  { %523 = vset.pattern.permute.xlu0 %v558_v20  ;;  %524 = vset.pattern.permute.xlu1 %v559_v2 }
  0x15   :  { %239 = vperm.xlu0 %523, %v609_v5   ;;  %321 = vperm.xlu1 %524, %v609_v5  }
  0x19   :  { %525 = vset.pattern.permute.xlu0 %v559_v2 }
  0x83   :  { %v41_v21 = vpop.permute.xlu0 %40  ;;  %v51_v22 = vpop.permute.xlu1 %50 }
  0x87   :  { %v46_v23 = vpop.permute.xlu0 %45  ;;  %v56_v24 = vpop.permute.xlu1 %55 }
  0x8b   :  { %v66_v35 = vpop.permute.xlu1 %65  ;;  %v61_v38 = vpop.permute.xlu0 %60 }
  0x8f   :  { %v76_v50 = vpop.permute.xlu1 %75  ;;  %v71_v53 = vpop.permute.xlu0 %70 }
  0x94   :  { %v240_v3 = vpop.permute.xlu0 %239  ;;  %v322_v11 = vpop.permute.xlu1 %321 }
  0xd9   :  { %v468_v25 = vpop.f32.mrb[0].mxu0 }
  0xda   :  { %v178_v26 = vadd.f32 %v468_v25, %v46_v23  ;;  %v172_v27 = vpop.f32.mrb[1].mxu0 }
  0xdb   :  { %v173_v28 = vadd.f32 %v172_v27, %v41_v21  ;;  %v398_v21 = vlaneseq }
  0xdc   :  { %v220_v29 = vmul.f32 0.01, %v178_v26  ;;  %vm212_vm2 = vcmp.ge.f32.partialorder %v178_v26, 0.0 }
  0xdd   :  { %v219_v30 = vmul.f32 0.01, %v173_v28  ;;  %v471_v31 = vpop.f32.mrb[2].mxu0  ;;  %vm211_vm3 = vcmp.ge.f32.partialorder %v173_v28, 0.0 }
  0xde   :  { %v188_v32 = vadd.f32 %v471_v31, %v56_v24  ;;  %v182_v33 = vpop.f32.mrb[3].mxu0  ;;  %v228_v34 = vsel %vm212_vm2, %v178_v26, %v220_v29  ;;  %v399_v26 = vshrl.u32 %v398_v21, 7 }
  0xdf   :  { %v183_v36 = vadd.f32 %v182_v33, %v51_v22  ;;  %v227_v37 = vsel %vm211_vm3, %v173_v28, %v219_v30 }
  0xe0   :  { %vm214_vm4 = vcmp.ge.f32.partialorder %v188_v32, 0.0  ;;  %v222_v39 = vmul.f32 0.01, %v188_v32  ;;  %v503_v40 = vpack.c.bf16 %v228_v34, %v227_v37  ;;  %vm400_vm14 = vcmp.ge.s32.totalorder %v399_v26, 4 }
  0xe1   :  { %vm213_vm5 = vcmp.ge.f32.partialorder %v183_v36, 0.0  ;;  %v221_v41 = vmul.f32 0.01, %v183_v36  ;;  %v474_v42 = vpop.f32.mrb[4].mxu0 }
  0xe2   :  { %v198_v43 = vadd.f32 %v474_v42, %v66_v35  ;;  %v192_v44 = vpop.f32.mrb[5].mxu0  ;;  %504 = vmatpush3.bf16.msra.mxu1 %v503_v40  ;;  %v230_v45 = vsel %vm214_vm4, %v188_v32, %v222_v39 }
  0xe3   :  { %v193_v46 = vadd.f32 %v192_v44, %v61_v38  ;;  %505 = vmatprep.subr.bf16.mxu1 %v555_v18  ;;  %v229_v47 = vsel %vm213_vm5, %v183_v36, %v221_v41 }
  0xe4   :  { %vm216_vm6 = vcmp.ge.f32.partialorder %v198_v43, 0.0  ;;  %v224_v48 = vmul.f32 0.01, %v198_v43  ;;  %v506_v49 = vpack.c.bf16 %v230_v45, %v229_v47 }
  0xe5   :  { %vm215_vm7 = vcmp.ge.f32.partialorder %v193_v46, 0.0  ;;  %v223_v51 = vmul.f32 0.01, %v193_v46  ;;  %v477_v52 = vpop.f32.mrb[6].mxu0 }
  0xe6   :  { %v208_v54 = vadd.f32 %v477_v52, %v76_v50  ;;  %v202_v55 = vpop.f32.mrb[7].mxu0  ;;  %507 = vmatpush3.bf16.msra.mxu1 %v506_v49  ;;  %v232_v56 = vsel %vm216_vm6, %v198_v43, %v224_v48 }
  0xe7   :  { %v203_v57 = vadd.f32 %v202_v55, %v71_v53  ;;  %508 = vmatprep.subr.bf16.mxu1 %v555_v18  ;;  %v231_v58 = vsel %vm215_vm7, %v193_v46, %v223_v51 }
  0xe8   :  { %vm218_vm8 = vcmp.ge.f32.partialorder %v208_v54, 0.0  ;;  %v226_v59 = vmul.f32 0.01, %v208_v54  ;;  %v509_v60 = vpack.c.bf16 %v232_v56, %v231_v58 }
  0xe9   :  { %vm217_vm9 = vcmp.ge.f32.partialorder %v203_v57, 0.0  ;;  %v225_v61 = vmul.f32 0.01, %v203_v57 }
  0xea   :  { %510 = vmatpush3.bf16.msra.mxu1 %v509_v60  ;;  %v234_v62 = vsel %vm218_vm8, %v208_v54, %v226_v59 }
  0xeb   :  { %511 = vmatprep.subr.bf16.mxu1 %v555_v18  ;;  %v233_v63 = vsel %vm217_vm9, %v203_v57, %v225_v61 }
  0xec   :  { %v512_v0 = vpack.c.bf16 %v234_v62, %v233_v63 }
  0xee   :  { %513 = vmatpush3.bf16.msra.mxu1 %v512_v0 }
  0xf1   :  { %495 = vmatmul.mubr.msk.f32.vlgmr.msra.gmra.mrb[0].mxu1 %vm242_vm10, %v235_v1 }
 0x1c4   :  { %v312_v4 = vpop.f32.mrb[0].mxu1 }
 0x1c5   :  { %v313_v6 = vadd.f32 %v312_v4, %v240_v3  ;;  %v496_v7 = vpop.f32.mrb[1].mxu1 }
 0x1c7   :  { %vm316_vm11 = vcmp.ge.f32.partialorder %v313_v6, 0.0  ;;  %v317_v8 = vmul.f32 0.01, %v313_v6 }
 0x1c9   :  { %v318_v10 = vsel %vm316_vm11, %v313_v6, %v317_v8 }
 0x1ca   :  { %498 = vmatpush3.msra.mxu0 %v318_v10 }
 0x1cb   :  { %500 = vmatmul.mubr.msk.f32.vlgmr.msra.gmra.mrb[8].mxu0 %vm324_vm12, %v319_v9 }
 0x29e   :  { %v394_v12 = vpop.f32.mrb[8].mxu0 }
 0x29f   :  { %v395_v13 = vadd.f32 %v394_v12, %v322_v11  ;;  %v501_v14 = vpop.f32.mrb[9].mxu0 }
 0x2a1   :  { %v402_v5 = vand.u32 2147483647, %v395_v13  ;;  %v401_v27 = vmax.f32 %v395_v13, 0.0 }
 0x2a3   :  { %v403_v15 = vsub.f32 0.0, %v402_v5 }
 0x2a5   :  { %v404_v16 = vmul.f32 1.442695, %v403_v15 }
 0x2a7   :  { %526 = vpow2.f32 %v404_v16 }
 0x2b1   :  { %v527_v17 = vpop.eup %526 }
 0x2b2   :  { %v406_v18 = vadd.f32 1.0, %v527_v17  ;;  %v409_v19 = vmul.f32 -0.5, %v527_v17  ;;  %v412_v22 = vand.u32 2147483647, %v527_v17 }
 0x2b4   :  { %528 = vlog2.f32 %v406_v18  ;;  %v410_v20 = vadd.f32 1.0, %v409_v19  ;;  %vm413_vm13 = vcmp.lt.f32.partialorder %v412_v22, 0.0004427343 }
 0x2b6   :  { %v411_v25 = vmul.f32 %v527_v17, %v410_v20 }
 0x2be   :  { %v529_v23 = vpop.eup %528 }
 0x2bf   :  { %v408_v24 = vmul.f32 0.6931472, %v529_v23 }
 0x2c1   :  { %v414_v28 = vsel %vm413_vm13, %v411_v25, %v408_v24 }
 0x2c2   :  { %v415_v29 = vadd.f32 %v414_v28, %v401_v27 }
 0x2c4   :  { %v416_v30 = vadd.f32 1e-05, %v415_v29 }
 0x2c6   :  { %v417_v31 = vsel %vm400_vm14, %v416_v30, %v395_v13 }
 0x2c7   :  { %418 = vst.msk [vmem:[#allocation2] sm:$0xff] %vm324_vm12, %v417_v31 }
 0x2c8   :  { %541 = shalt.err (!%p538_p4)
}
 0x2c9   :  { %s542_s30 = scalar_lea.hbm %s686_s5, 128 }
 0x2ca   :  { %p543_p5 = scmp.ne.s32.totalorder %s686_s5, %s542_s30  ;;  %p546_p6 = scmp.lt.u32.totalorder %s542_s30, %s686_s5 }
 0x2cc   :  { %p548_p7 = pnand %p546_p6, %p543_p5 }
 0x2ce   :  { %551 = shalt.err (!%p548_p7)
}
 0x2cf   :  { %428 = dma.vmem_to_hbm [thread:$0]  %s426_s3, 128, %s686_s5, [#allocation3]  }
 0x2d0   :  { %552 = dma.done.wait [#allocation3], 128  }
 0x2d1   :  { %553 = vsyncadd [#allocation3], 4294967168 }
 0x2d2   :  { %432 = vsyncpa [#allocation3], 1 }

</bundles_post_ra>
